<compile_context>
chip_gen: v6e
topology: v6e:2x2x1
jax: 0.10.0
libtpu: 0.0.40
codegen_flags: <defaults>
</compile_context>

<pallas_src>
import functools

import jax
import jax.numpy as jnp
from jax.experimental import pallas as pl
from jax.experimental.pallas import tpu as pltpu


def _round_up(n: int, m: int) -> int:
    return ((n + m - 1) // m) * m


def _layernorm_kernel(x_ref, a_ref, b_ref, o_ref, *, eps, feat):
    # x_ref: (tile_b, feat) rows of input (feat == full valid feature width,
    # so sums along the last axis are over exactly the valid columns).
    # a_ref, b_ref: (1, feat) f32 scale / bias (pre-cast once in the wrapper).
    x = x_ref[...].astype(jnp.float32)

    mean = jnp.sum(x, axis=-1, keepdims=True) * (1.0 / feat)
    diff = x - mean

    # torch.std default is unbiased (divides by N-1); eps is added to the std.
    denom = max(feat - 1, 1)  # guard the degenerate feat == 1 case
    var = jnp.sum(diff * diff, axis=-1, keepdims=True) * (1.0 / denom)

    # Per-row reciprocal instead of a per-element divide.  approx=False keeps
    # the exact full-precision divide (needed for the 1e-5 check); it is only
    # tile_b scalars, negligible next to the per-element work.
    inv = pl.reciprocal(jnp.sqrt(var) + eps, approx=False)

    # a_2 * (x - mean) / (std + eps) + b_2
    # (diff * inv) first keeps only one extra (tile_b, feat) f32 temporary live.
    o_ref[...] = ((diff * inv) * a_ref[...] + b_ref[...]).astype(o_ref.dtype)
    # TODO(synk): on v7x with bf16 inputs, a single-pass sum(x)/sum(x*x) or an
    # MXU row-sum (dot with a ones vector) would shave VALU work; kept two-pass
    # here to preserve the tight numerical tolerance.


def _vmem_capacity_bytes() -> int:
    try:
        info = pltpu.get_tpu_info()
        cap = getattr(info, "vmem_capacity_bytes", None)
        if cap:
            return int(cap)
    except Exception:
        pass
    return 64 * 1024 * 1024  # conservative fallback (v7x per-core size)


def _pick_tile_and_vmem(batch: int, feat: int, itemsize: int):
    """Row tile + vmem limit with honest per-step VMEM accounting."""
    gran = 16 if itemsize <= 2 else 8            # sublane packing granularity
    vmem_cap = _vmem_capacity_bytes()
    small_vmem = vmem_cap < 100 * 1024 * 1024    # v7x-class: 64 MiB, 2 TCs

    # Per-row footprint: double-buffered in+out DMA tiles PLUS ~3 live
    # (tile_b, feat) f32 temporaries inside the kernel body.
    per_row = feat * (4 * itemsize + 3 * 4)
    budget = (28 if small_vmem else 48) * 1024 * 1024
    tile_b = max(gran, min(budget // per_row, 1024))
    # Never bigger than the (rounded-up) batch.
    tile_b = min(tile_b, _round_up(batch, gran))
    if small_vmem and batch > 2 * gran:
        # 2-TensorCore chips: keep >= 2 grid steps so the "parallel" batch
        # axis can shard across both cores.  Skipped on 1-TC generations,
        # where it would only halve the tile for no benefit.
        tile_b = min(tile_b, _round_up(pl.cdiv(batch, 2), gran))
    tile_b = max(gran, (tile_b // gran) * gran)

    # vmem limit: computed footprint + headroom (v7x), generous cap otherwise.
    footprint = (4 * tile_b * feat * itemsize     # 2x double-buffered in + out
                 + 3 * tile_b * feat * 4          # in-kernel f32 temporaries
                 + 4 * feat * 4)                  # scale / bias buffers
    if small_vmem:
        vmem_limit = min(footprint + 8 * 1024 * 1024, vmem_cap * 3 // 4)
    else:
        vmem_limit = min(96 * 1024 * 1024, vmem_cap * 3 // 4)
    vmem_limit = max(vmem_limit, 16 * 1024 * 1024)
    return int(tile_b), int(vmem_limit)


def layer_norm(x, a_2, b_2, eps=1e-6, tile_b=None):
    """LayerNorm forward identical to the PyTorch module (unbiased std, eps on std)."""
    B, F = x.shape
    itemsize = jnp.dtype(x.dtype).itemsize

    auto_tile, vmem_limit = _pick_tile_and_vmem(B, F, itemsize)
    if tile_b is None:
        tile_b = auto_tile
    tile_b = max(8, (tile_b // 8) * 8)

    # Scale / bias: cast to f32 once, shaped (1, F) for a full-extent block.
    a_p = a_2.astype(jnp.float32).reshape(1, F)
    b_p = b_2.astype(jnp.float32).reshape(1, F)

    kernel = functools.partial(_layernorm_kernel, eps=eps, feat=F)

    out = pl.pallas_call(
        kernel,
        out_shape=jax.ShapeDtypeStruct((B, F), x.dtype),
        grid_spec=pltpu.PrefetchScalarGridSpec(
            num_scalar_prefetch=0,
            grid=(pl.cdiv(B, tile_b),),
            in_specs=[
                # Last block dim == full F (always layout-legal, no HBM pad).
                pl.BlockSpec((tile_b, F), lambda i: (i, 0)),
                pl.BlockSpec((1, F), lambda i: (0, 0)),
                pl.BlockSpec((1, F), lambda i: (0, 0)),
            ],
            out_specs=pl.BlockSpec((tile_b, F), lambda i: (i, 0)),
        ),
        compiler_params=pltpu.CompilerParams(
            dimension_semantics=("parallel",),
            vmem_limit_bytes=vmem_limit,
        ),
    )(x, a_p, b_p)
    return out


if __name__ == "__main__":
    key = jax.random.PRNGKey(0)
    batch, features = 8, 32

    x = jax.random.normal(key, (batch, features), dtype=jnp.float32)
    # Deterministic parameter init, matching nn.Parameter(torch.ones/zeros(features))
    a_2 = jnp.ones((features,), dtype=jnp.float32)
    b_2 = jnp.zeros((features,), dtype=jnp.float32)

    out = layer_norm(x, a_2, b_2, eps=1e-6)
    out = jax.block_until_ready(out)

    # Reference in plain JAX (unbiased std, eps added to std) for sanity check
    mean = jnp.mean(x, axis=-1, keepdims=True)
    std = jnp.std(x, axis=-1, keepdims=True, ddof=1)
    ref = a_2 * (x - mean) / (std + 1e-6) + b_2
    assert jnp.allclose(out, ref, atol=1e-5, rtol=1e-5), "mismatch vs reference"

    print("KERNEL_OK")
</pallas_src>

<mosaic_0001>
module attributes {stable_mosaic.version = 11 : i64} {
  func.func @_layernorm_kernel(%arg0: i32, %arg1: memref<8x32xf32, #tpu.memory_space<vmem>>, %arg2: memref<1x32xf32, #tpu.memory_space<vmem>>, %arg3: memref<1x32xf32, #tpu.memory_space<vmem>>, %arg4: memref<8x32xf32, #tpu.memory_space<vmem>>) attributes {dimension_semantics = [#tpu.dimension_semantics<parallel>], iteration_bounds = array<i64: 1>, scalar_prefetch = 0 : i64, scratch_operands = 0 : i64, tpu.core_type = #tpu.core_type<tc>, window_params = [{transform_indices = @transform_0, window_bounds = array<i64: 8, 32>}, {pipeline_mode = #tpu.pipeline_mode<synchronous>, transform_indices = @transform_1, window_bounds = array<i64: 1, 32>}, {pipeline_mode = #tpu.pipeline_mode<synchronous>, transform_indices = @transform_2, window_bounds = array<i64: 1, 32>}, {transform_indices = @transform_3, window_bounds = array<i64: 8, 32>}]} {
    %c0 = arith.constant 0 : index
    %c0_0 = arith.constant 0 : index
    %0 = vector.load %arg1[%c0, %c0_0] : memref<8x32xf32, #tpu.memory_space<vmem>>, vector<8x32xf32>
    %cst = arith.constant dense<0.000000e+00> : vector<8xf32>
    %1 = vector.multi_reduction <add>, %0, %cst [1] : vector<8x32xf32> to vector<8xf32>
    %2 = vector.shape_cast %1 : vector<8xf32> to vector<8x1xf32>
    %cst_1 = arith.constant 3.125000e-02 : f32
    %3 = vector.broadcast %cst_1 : f32 to vector<8x1xf32>
    %4 = arith.mulf %2, %3 : vector<8x1xf32>
    %5 = vector.broadcast %4 : vector<8x1xf32> to vector<8x32xf32>
    %6 = arith.subf %0, %5 : vector<8x32xf32>
    %7 = arith.mulf %6, %6 : vector<8x32xf32>
    %cst_2 = arith.constant dense<0.000000e+00> : vector<8xf32>
    %8 = vector.multi_reduction <add>, %7, %cst_2 [1] : vector<8x32xf32> to vector<8xf32>
    %9 = vector.shape_cast %8 : vector<8xf32> to vector<8x1xf32>
    %cst_3 = arith.constant 0.0322580636 : f32
    %10 = vector.broadcast %cst_3 : f32 to vector<8x1xf32>
    %11 = arith.mulf %9, %10 : vector<8x1xf32>
    %12 = math.sqrt %11 : vector<8x1xf32>
    %cst_4 = arith.constant 9.99999997E-7 : f32
    %13 = vector.broadcast %cst_4 : f32 to vector<8x1xf32>
    %14 = arith.addf %12, %13 : vector<8x1xf32>
    %15 = tpu.reciprocal %14 : vector<8x1xf32> -> vector<8x1xf32>
    %16 = vector.broadcast %15 : vector<8x1xf32> to vector<8x32xf32>
    %17 = arith.mulf %6, %16 : vector<8x32xf32>
    %c0_5 = arith.constant 0 : index
    %c0_6 = arith.constant 0 : index
    %18 = vector.load %arg2[%c0_5, %c0_6] : memref<1x32xf32, #tpu.memory_space<vmem>>, vector<1x32xf32>
    %19 = vector.broadcast %18 : vector<1x32xf32> to vector<8x32xf32>
    %20 = arith.mulf %17, %19 : vector<8x32xf32>
    %c0_7 = arith.constant 0 : index
    %c0_8 = arith.constant 0 : index
    %21 = vector.load %arg3[%c0_7, %c0_8] : memref<1x32xf32, #tpu.memory_space<vmem>>, vector<1x32xf32>
    %22 = vector.broadcast %21 : vector<1x32xf32> to vector<8x32xf32>
    %23 = arith.addf %20, %22 : vector<8x32xf32>
    %c0_9 = arith.constant 0 : index
    %c0_10 = arith.constant 0 : index
    %24 = vector.load %arg4[%c0_9, %c0_10] : memref<8x32xf32, #tpu.memory_space<vmem>>, vector<8x32xf32>
    tpu.vector_store %arg4[%c0_9, %c0_10], %23 {strides = array<i32>} : memref<8x32xf32, #tpu.memory_space<vmem>>, vector<8x32xf32>,
    return
  }
  func.func @transform_0(%arg0: i32) -> (i32, i32) {
    %c0_i32 = arith.constant 0 : i32
    %c0_i32_0 = arith.constant 0 : i32
    return %arg0, %c0_i32 : i32, i32
  }
  func.func @transform_1(%arg0: i32) -> (i32, i32) {
    %c0_i32 = arith.constant 0 : i32
    %c0_i32_0 = arith.constant 0 : i32
    %c0_i32_1 = arith.constant 0 : i32
    return %c0_i32, %c0_i32_0 : i32, i32
  }
  func.func @transform_2(%arg0: i32) -> (i32, i32) {
    %c0_i32 = arith.constant 0 : i32
    %c0_i32_0 = arith.constant 0 : i32
    %c0_i32_1 = arith.constant 0 : i32
    return %c0_i32, %c0_i32_0 : i32, i32
  }
  func.func @transform_3(%arg0: i32) -> (i32, i32) {
    %c0_i32 = arith.constant 0 : i32
    %c0_i32_0 = arith.constant 0 : i32
    return %arg0, %c0_i32 : i32, i32
  }
}

</mosaic_0001>

<bundles_post_ra>
// kernel: tpu_custom_call.1
= control target key start
LH: loop header
LB: loop body
LE: loop exit
PB: predicated region body
PF: predicated region fallthrough
CT: control target
= control target key end

     0   :  { %8 = vsyncpa [#allocation3], 0  ;;  %s170_s0 = inlined_call_operand.hbm [shape: f32[8,32], index: 0, kind: input, shape index: {}]   ;;  %s171_s1 = inlined_call_operand.vmem [shape: f32[1,32], index: 1, kind: input, shape index: {}]   ;;  %s172_s2 = inlined_call_operand.vmem [shape: f32[1,32], index: 2, kind: input, shape index: {}]   ;;  %s173_s3 = inlined_call_operand.hbm [shape: f32[8,32], index: 3, kind: output, shape index: {}]  }
   0x1   :  { %9 = vsyncpa [#allocation4], 0  ;;  %s133_s12 = smov [#allocation2]  }
   0x2   :  { %s16_s13 = sshll.u32 %s133_s12, 4  ;;  %s17_s13 = int_to_ptr.vmem [resolvable:$true] %s16_s13 }
   0x3   :  { %s97_s14 = scalar_lea.vmem %s17_s13, 128  ;;  %p102_p1 = scmp.lt.s32.totalorder %s17_s13, %s17_s13 }
   0x4   :  { %p98_p0 = scmp.ne.s32.totalorder %s17_s13, %s97_s14  ;;  %p103_p2 = scmp.lt.s32.totalorder %s97_s14, %s97_s14 }
   0x6   :  { %p104_p3 = por %p103_p2, %p102_p1 }
   0x8   :  { %p105_p4 = pnand %p104_p3, %p98_p0 }
   0xa   :  { %108 = shalt.err (!%p105_p4)
}
   0xb   :  { %19 = dma.hbm_to_vmem [thread:$0]  %s170_s0, 128, %s17_s13, [#allocation3]  }
   0xc   :  { %129 = dma.done.wait [#allocation3], 128  }
   0xd   :  { %130 = vsyncadd [#allocation3], 4294967168  ;;  %vm28_vm0 = vcmask 261120   ;;  %v27_v0 = vld [vmem:[#allocation2] sm:$0xff]  ;;  %s134_s20 = smov [#allocation5]  }
   0xe   :  { %v29_v1 = vsel %vm28_vm0, %v27_v0, 0.0  ;;  %v81_v16 = vld [vmem:[%s171_s1] ss:$0 sm:$0xff]  ;;  %s72_s21 = sshll.u32 %s134_s20, 4  ;;  %s73_s21 = int_to_ptr.vmem [resolvable:$true] %s72_s21 }
   0xf   :  { %30 = vadd.xlane.f32.xlu0 %v29_v1  ;;  %v82_v18 = vld [vmem:[%s172_s2] ss:$0 sm:$0xff]  ;;  %s109_s22 = scalar_lea.vmem %s73_s21, 128  ;;  %p114_p6 = scmp.lt.s32.totalorder %s73_s21, %s73_s21 }
  0x10   :  { %p110_p5 = scmp.ne.s32.totalorder %s73_s21, %s109_s22  ;;  %p115_p7 = scmp.lt.s32.totalorder %s109_s22, %s109_s22 }
  0x12   :  { %p116_p8 = por %p115_p7, %p114_p6 }
  0x14   :  { %p117_p9 = pnand %p116_p8, %p110_p5 }
  0x98   :  { %v31_v2 = vpop.xlane.xlu0 %30 }
  0x99   :  { %v32_v3 = vmul.f32 0.03125, %v31_v2 }
  0x9b   :  { %v33_v4 = vsub.f32 %v27_v0, %v32_v3 }
  0x9d   :  { %v34_v5 = vmul.f32 %v33_v4, %v33_v4 }
  0x9f   :  { %v35_v6 = vsel %vm28_vm0, %v34_v5, 0.0 }
  0xa0   :  { %36 = vadd.xlane.f32.xlu0 %v35_v6 }
 0x129   :  { %v37_v7 = vpop.xlane.xlu0 %36 }
 0x12a   :  { %v38_v8 = vmul.f32 0.032258064, %v37_v7 }
 0x12c   :  { %85 = vrsqrt.f32 %v38_v8  ;;  %vm41_vm1 = vcmp.eq.f32.partialorder %v38_v8, inf  ;;  %v44_v11 = vand.u32 2147483648, %v38_v8  ;;  %vm43_vm2 = vcmp.eq.f32.partialorder %v38_v8, 0.0 }
 0x139   :  { %v86_v9 = vpop.eup %85 }
 0x13a   :  { %v40_v10 = vmul.f32 %v86_v9, %v38_v8 }
 0x13c   :  { %v42_v12 = vsel %vm41_vm1, %v38_v8, %v40_v10 }
 0x13d   :  { %v45_v13 = vsel %vm43_vm2, %v44_v11, %v42_v12 }
 0x13e   :  { %v46_v14 = vadd.f32 1e-06, %v45_v13 }
 0x140   :  { %87 = vrcp.f32 %v46_v14 }
 0x14d   :  { %v88_v15 = vpop.eup %87 }
 0x14e   :  { %v48_v17 = vmul.f32 %v88_v15, %v33_v4 }
 0x150   :  { %v56_v19 = vmul.f32 %v81_v16, %v48_v17 }
 0x152   :  { %v64_v20 = vadd.f32 %v82_v18, %v56_v19 }
 0x154   :  { %65 = vst.msk [vmem:[#allocation5] sm:$0xff] %vm28_vm0, %v64_v20 }
 0x155   :  { %120 = shalt.err (!%p117_p9)
}
 0x156   :  { %75 = dma.vmem_to_hbm [thread:$0]  %s73_s21, 128, %s173_s3, [#allocation4]  }
 0x157   :  { %131 = dma.done.wait [#allocation4], 128  }
 0x158   :  { %132 = vsyncadd [#allocation4], 4294967168 }
 0x159   :  { %79 = vsyncpa [#allocation3], 1 }
 0x15a   :  { %80 = vsyncpa [#allocation4], 1 }

</bundles_post_ra>
